<compile_context>
chip_gen: v6e
topology: v6e:2x2x1
jax: 0.10.0
libtpu: 0.0.40
codegen_flags: <defaults>
</compile_context>

<pallas_src>
import functools

import jax
import jax.numpy as jnp
from jax import lax
from jax.experimental import pallas as pl
from jax.experimental.pallas import tpu as pltpu

_LANE = 128
_CHUNK = 8          # sublane rows processed per inner-loop step


def _tcl_kernel(z_ref, out_ref, prev_ref, *, T, D, t_tile, d_tile):
    """One (t_tile, d_tile) slab: per-lane f32 sum of squared temporal diffs."""
    di = pl.program_id(0)               # d-tile index ("parallel")
    ti = pl.program_id(1)               # t-slab index ("arbitrary", sequential)

    @pl.when(ti == 0)
    def _init():
        out_ref[...] = jnp.zeros_like(out_ref)
        prev_ref[...] = jnp.zeros_like(prev_ref)

    r0 = ti * t_tile                    # global row offset of this slab
    c0 = di * d_tile                    # global col offset of this d-tile

    col_ids = lax.broadcasted_iota(jnp.int32, (1, d_tile), 1) + c0
    col_ok = col_ids < D                # ragged-D tail mask (lane axis)
    row_iota = lax.broadcasted_iota(jnp.int32, (_CHUNK, 1), 0)

    num_chunks = t_tile // _CHUNK

    def chunk_body(c, carry):
        prev, acc = carry               # prev: (1, d_tile) f32, acc: (_CHUNK, d_tile) f32
        start = pl.multiple_of(c * _CHUNK, _CHUNK)
        cur = z_ref[pl.ds(start, _CHUNK), :].astype(jnp.float32)
        # shifted[j] = row above cur[j]; row 0 uses the carried boundary row.
        shifted = jnp.where(row_iota == 0, prev,
                            pltpu.roll(cur, shift=1, axis=0))
        g = row_iota + (r0 + c * _CHUNK)              # global row index of cur rows
        ok = (g >= 1) & (g < T) & col_ok              # pair (g-1, g) in range, col valid
        diff = jnp.where(ok, cur - shifted, 0.0)      # mask BEFORE squaring (NaN-safe)
        acc = acc + diff * diff
        prev = cur[_CHUNK - 1:_CHUNK, :]
        return prev, acc

    carry0 = (prev_ref[...], jnp.zeros((_CHUNK, d_tile), jnp.float32))
    prev_f, acc_f = lax.fori_loop(0, num_chunks, chunk_body, carry0,
                                  unroll=min(num_chunks, 8))
    prev_ref[...] = prev_f                            # boundary row for next T-slab
    out_ref[...] += jnp.sum(acc_f, axis=0, keepdims=True).reshape(1, 1, d_tile)


def _round_up(x, m):
    return -(-x // m) * m


def _vmem_capacity_bytes():
    try:
        cap = getattr(pltpu.get_tpu_info(), "vmem_capacity_bytes", None)
        if cap:
            return int(cap)
    except Exception:
        pass
    return 64 * 1024 * 1024                           # conservative (v7x) fallback


def _choose_tiles(T, D, itemsize):
    cap = _vmem_capacity_bytes()
    # per-step input block budget; double-buffered blocks + small temps must fit VMEM
    block_budget = int(min(16 * 1024 * 1024, cap // 5))
    row_mult = _CHUNK * max(1, 4 // max(itemsize, 1))  # keep packed sublane tiles whole
    d_tile = min(1024, _round_up(D, _LANE))            # lane-dense, vreg-friendly
    t_rows = max(row_mult,
                 (block_budget // (d_tile * itemsize)) // row_mult * row_mult)
    t_tile = min(_round_up(T, row_mult), t_rows)
    num_d = -(-D // d_tile)
    num_t = -(-T // t_tile)
    # ensure >= 2 grid steps so the auto-pipeline overlaps DMA with compute
    if num_d * num_t == 1 and T >= 2 * row_mult:
        t_tile = _round_up(-(-T // 2), row_mult)
        num_t = -(-T // t_tile)
    vmem_limit = int(min(max(2 * t_tile * d_tile * itemsize + (8 << 20), 32 << 20),
                         cap * 3 // 4))
    return d_tile, t_tile, num_d, num_t, vmem_limit


def _tcl_jax(z2, weight):
    d = z2[1:].astype(jnp.float32) - z2[:-1].astype(jnp.float32)
    return (jnp.float32(weight) * jnp.mean(d * d)).astype(jnp.float32)


def _tcl_pallas(z2, weight, T, D):
    itemsize = z2.dtype.itemsize
    d_tile, t_tile, num_d, num_t, vmem_limit = _choose_tiles(T, D, itemsize)
    kernel = functools.partial(_tcl_kernel, T=T, D=D, t_tile=t_tile, d_tile=d_tile)

    partials = pl.pallas_call(
        kernel,
        out_shape=jax.ShapeDtypeStruct((num_d, 1, d_tile), jnp.float32),
        grid=(num_d, num_t),
        in_specs=[pl.BlockSpec((t_tile, d_tile), lambda di, ti: (ti, di))],
        out_specs=pl.BlockSpec((1, 1, d_tile), lambda di, ti: (di, 0, 0)),
        scratch_shapes=[pltpu.VMEM((1, d_tile), jnp.float32)],   # T-slab boundary row
        compiler_params=pltpu.CompilerParams(
            dimension_semantics=("parallel", "arbitrary"),
            vmem_limit_bytes=vmem_limit,
        ),
    )(z2)

    inv_count = 1.0 / float((T - 1) * D)              # original (unpadded) D
    return (jnp.float32(weight) * jnp.float32(inv_count)
            * jnp.sum(partials)).astype(jnp.float32)


def temporal_consistency_loss(z, weight: float = 0.3, use_pallas=None):
    """JAX/Pallas equivalent of TemporalConsistencyLoss.forward."""
    T = z.shape[0]
    if T < 2:                                         # mirrors `if z.size(0) < 2`
        return jnp.float32(0.0)

    z2 = z.reshape(T, -1)                             # keep native dtype; upcast in-kernel
    D = z2.shape[1]

    if use_pallas is None:                            # pallas_call overhead loses below ~256 KiB
        use_pallas = T * D * z2.dtype.itemsize >= 256 * 1024
    if not use_pallas:
        return _tcl_jax(z2, weight)
    return _tcl_pallas(z2, weight, T, D)


if __name__ == "__main__":
    key = jax.random.PRNGKey(0)
    k1, k2, k3, k4 = jax.random.split(key, 4)

    def ref(z, w=0.3):
        z2 = z.reshape(z.shape[0], -1).astype(jnp.float32)
        d = z2[1:] - z2[:-1]
        return w * jnp.mean(d * d)

    # (1) f32, seq of (8, 32) feature maps -> (T=16, D=256); two T-slabs (boundary carry).
    z_a = jax.random.normal(k1, (16, 8, 32), dtype=jnp.float32)
    out_a = jax.block_until_ready(temporal_consistency_loss(z_a, 0.3, use_pallas=True))
    assert jnp.allclose(out_a, ref(z_a), rtol=1e-5, atol=1e-6), (out_a, ref(z_a))

    # (2) bf16 input, D=1536 -> two d-tiles, ragged-D tail mask in the second tile.
    z_b = jax.random.normal(k2, (16, 1536), dtype=jnp.float32).astype(jnp.bfloat16)
    out_b = jax.block_until_ready(temporal_consistency_loss(z_b, 0.3, use_pallas=True))
    assert jnp.allclose(out_b, ref(z_b), rtol=2e-4, atol=1e-5), (out_b, ref(z_b))

    # (3) ragged T (13) and narrow D (96): forced Pallas, row + col tail masks.
    z_c = jax.random.normal(k3, (13, 96), dtype=jnp.float32)
    out_c = jax.block_until_ready(temporal_consistency_loss(z_c, 0.3, use_pallas=True))
    assert jnp.allclose(out_c, ref(z_c), rtol=1e-5, atol=1e-6), (out_c, ref(z_c))

    # (4) auto path: small input falls back to fused JAX, same semantics.
    out_d = jax.block_until_ready(temporal_consistency_loss(z_c, 0.3))
    assert jnp.allclose(out_d, ref(z_c), rtol=1e-5, atol=1e-6), (out_d, ref(z_c))

    # (5) degenerate case: fewer than 2 time steps -> 0.0
    z_e = jax.random.normal(k4, (1, 32), dtype=jnp.float32)
    assert float(temporal_consistency_loss(z_e)) == 0.0

    print("KERNEL_OK")
</pallas_src>

<mosaic_0001>
module attributes {stable_mosaic.version = 11 : i64} {
  func.func @_tcl_kernel(%arg0: i32, %arg1: i32, %arg2: memref<8x256xf32, #tpu.memory_space<vmem>>, %arg3: memref<1x1x256xf32, #tpu.memory_space<vmem>>, %arg4: memref<1x256xf32, #tpu.memory_space<vmem>>) attributes {dimension_semantics = [#tpu.dimension_semantics<parallel>, #tpu.dimension_semantics<arbitrary>], iteration_bounds = array<i64: 1, 2>, scalar_prefetch = 0 : i64, scratch_operands = 1 : i64, tpu.core_type = #tpu.core_type<tc>, window_params = [{transform_indices = @transform_0, window_bounds = array<i64: 8, 256>}, {transform_indices = @transform_1, window_bounds = array<i64: 1, 1, 256>}]} {
    %c0_i32 = arith.constant 0 : i32
    %0 = arith.cmpi eq, %arg1, %c0_i32 : i32
    %1 = arith.extui %0 : i1 to i32
    %c0_i32_0 = arith.constant 0 : i32
    %2 = arith.cmpi ne, %1, %c0_i32_0 : i32
    scf.if %2 {
      %cst_20 = arith.constant 0.000000e+00 : f32
      %50 = vector.broadcast %cst_20 : f32 to vector<1x1x256xf32>
      %c0_21 = arith.constant 0 : index
      %c0_22 = arith.constant 0 : index
      %c0_23 = arith.constant 0 : index
      %51 = vector.load %arg3[%c0_21, %c0_22, %c0_23] : memref<1x1x256xf32, #tpu.memory_space<vmem>>, vector<1x1x256xf32>
      tpu.vector_store %arg3[%c0_21, %c0_22, %c0_23], %50 {strides = array<i32>} : memref<1x1x256xf32, #tpu.memory_space<vmem>>, vector<1x1x256xf32>,
      %cst_24 = arith.constant 0.000000e+00 : f32
      %52 = vector.broadcast %cst_24 : f32 to vector<1x256xf32>
      %c0_25 = arith.constant 0 : index
      %c0_26 = arith.constant 0 : index
      %53 = vector.load %arg4[%c0_25, %c0_26] : memref<1x256xf32, #tpu.memory_space<vmem>>, vector<1x256xf32>
      tpu.vector_store %arg4[%c0_25, %c0_26], %52 {strides = array<i32>} : memref<1x256xf32, #tpu.memory_space<vmem>>, vector<1x256xf32>,
    } else {
    }
    %c8_i32 = arith.constant 8 : i32
    %3 = arith.muli %arg1, %c8_i32 : i32
    %c256_i32 = arith.constant 256 : i32
    %4 = arith.muli %arg0, %c256_i32 : i32
    %5 = tpu.iota {dimensions = array<i32: 1>} : vector<1x256xi32>
    %6 = vector.broadcast %4 : i32 to vector<1x256xi32>
    %7 = arith.addi %5, %6 : vector<1x256xi32>
    %c256_i32_1 = arith.constant 256 : i32
    %8 = vector.broadcast %c256_i32_1 : i32 to vector<1x256xi32>
    %9 = arith.cmpi slt, %7, %8 : vector<1x256xi32>
    %10 = tpu.iota {dimensions = array<i32: 0>} : vector<8x1xi32>
    %c0 = arith.constant 0 : index
    %c0_2 = arith.constant 0 : index
    %11 = vector.load %arg4[%c0, %c0_2] : memref<1x256xf32, #tpu.memory_space<vmem>>, vector<1x256xf32>
    %cst = arith.constant 0.000000e+00 : f32
    %12 = vector.broadcast %cst : f32 to vector<8x256xf32>
    %c0_i32_3 = arith.constant 0 : i32
    %c8_i32_4 = arith.constant 8 : i32
    %13 = arith.muli %c0_i32_3, %c8_i32_4 : i32
    %14 = tpu.assume_multiple %13, 8 : i32
    %15 = arith.index_cast %14 : i32 to index
    %c0_5 = arith.constant 0 : index
    %16 = vector.load %arg2[%15, %c0_5] : memref<8x256xf32, #tpu.memory_space<vmem>>, vector<8x256xf32>
    %c0_i32_6 = arith.constant 0 : i32
    %17 = vector.broadcast %c0_i32_6 : i32 to vector<8x1xi32>
    %18 = arith.cmpi eq, %10, %17 : vector<8x1xi32>
    %c1_i32 = arith.constant 1 : i32
    %19 = tpu.dynamic_rotate %16 by %c1_i32 dim 0 : vector<8x256xf32>, i32 -> vector<8x256xf32>
    %20 = vector.shape_cast %18 : vector<8x1xi1> to vector<8x1xi1>
    %21 = vector.broadcast %20 : vector<8x1xi1> to vector<8x256xi1>
    %22 = vector.shape_cast %11 : vector<1x256xf32> to vector<1x256xf32>
    %23 = vector.broadcast %22 : vector<1x256xf32> to vector<8x256xf32>
    %24 = arith.select %21, %23, %19 : vector<8x256xi1>, vector<8x256xf32>
    %c8_i32_7 = arith.constant 8 : i32
    %25 = arith.muli %c0_i32_3, %c8_i32_7 : i32
    %26 = arith.addi %3, %25 : i32
    %27 = vector.broadcast %26 : i32 to vector<8x1xi32>
    %28 = arith.addi %10, %27 : vector<8x1xi32>
    %c1_i32_8 = arith.constant 1 : i32
    %29 = vector.broadcast %c1_i32_8 : i32 to vector<8x1xi32>
    %30 = arith.cmpi sge, %28, %29 : vector<8x1xi32>
    %c16_i32 = arith.constant 16 : i32
    %31 = vector.broadcast %c16_i32 : i32 to vector<8x1xi32>
    %32 = arith.cmpi slt, %28, %31 : vector<8x1xi32>
    %33 = arith.andi %30, %32 : vector<8x1xi1>
    %34 = vector.broadcast %33 : vector<8x1xi1> to vector<8x256xi1>
    %35 = vector.broadcast %9 : vector<1x256xi1> to vector<8x256xi1>
    %36 = arith.andi %34, %35 : vector<8x256xi1>
    %37 = arith.subf %16, %24 : vector<8x256xf32>
    %cst_9 = arith.constant 0.000000e+00 : f32
    %38 = vector.broadcast %cst_9 : f32 to vector<8x256xf32>
    %39 = arith.select %36, %37, %38 : vector<8x256xi1>, vector<8x256xf32>
    %40 = arith.mulf %39, %39 : vector<8x256xf32>
    %41 = arith.addf %12, %40 : vector<8x256xf32>
    %42 = vector.extract_strided_slice %16 {offsets = [7, 0], sizes = [1, 256], strides = [1, 1]} : vector<8x256xf32> to vector<1x256xf32>
    %c1_i32_10 = arith.constant 1 : i32
    %c0_11 = arith.constant 0 : index
    %c0_12 = arith.constant 0 : index
    %43 = vector.load %arg4[%c0_11, %c0_12] : memref<1x256xf32, #tpu.memory_space<vmem>>, vector<1x256xf32>
    tpu.vector_store %arg4[%c0_11, %c0_12], %42 {strides = array<i32>} : memref<1x256xf32, #tpu.memory_space<vmem>>, vector<1x256xf32>,
    %c0_13 = arith.constant 0 : index
    %c0_14 = arith.constant 0 : index
    %c0_15 = arith.constant 0 : index
    %44 = vector.load %arg3[%c0_13, %c0_14, %c0_15] : memref<1x1x256xf32, #tpu.memory_space<vmem>>, vector<1x1x256xf32>
    %cst_16 = arith.constant dense<0.000000e+00> : vector<256xf32>
    %45 = vector.multi_reduction <add>, %41, %cst_16 [0] : vector<8x256xf32> to vector<256xf32>
    %46 = vector.shape_cast %45 : vector<256xf32> to vector<1x256xf32>
    %47 = vector.shape_cast %46 : vector<1x256xf32> to vector<1x1x256xf32>
    %48 = arith.addf %44, %47 : vector<1x1x256xf32>
    %c0_17 = arith.constant 0 : index
    %c0_18 = arith.constant 0 : index
    %c0_19 = arith.constant 0 : index
    %49 = vector.load %arg3[%c0_17, %c0_18, %c0_19] : memref<1x1x256xf32, #tpu.memory_space<vmem>>, vector<1x1x256xf32>
    tpu.vector_store %arg3[%c0_17, %c0_18, %c0_19], %48 {strides = array<i32>} : memref<1x1x256xf32, #tpu.memory_space<vmem>>, vector<1x1x256xf32>,
    return
  }
  func.func @transform_0(%arg0: i32, %arg1: i32) -> (i32, i32) {
    %c0_i32 = arith.constant 0 : i32
    return %arg1, %arg0 : i32, i32
  }
  func.func @transform_1(%arg0: i32, %arg1: i32) -> (i32, i32, i32) {
    %c0_i32 = arith.constant 0 : i32
    %c0_i32_0 = arith.constant 0 : i32
    %c0_i32_1 = arith.constant 0 : i32
    return %arg0, %c0_i32, %c0_i32_0 : i32, i32, i32
  }
}

</mosaic_0001>

<bundles_post_ra>
// kernel: tpu_custom_call.1
= control target key start
LH: loop header
LB: loop body
LE: loop exit
PB: predicated region body
PF: predicated region fallthrough
CT: control target
= control target key end

     0   :  { %6 = vsyncpa [#allocation4], 0  ;;  %s667_s0 = inlined_call_operand.hbm [shape: f32[16,256], index: 0, kind: input, shape index: {}]   ;;  %s668_s1 = inlined_call_operand.hbm [shape: f32[1,1,256], index: 1, kind: output, shape index: {}]  }
   0x1   :  { %8 = vsyncpa [#allocation4 + $0x1], 0 }
   0x2   :  { %9 = vsyncpa [#allocation5], 0  ;;  %s543_s6 = smov 0   ;;  %s545_s7 = smov 0  }
   0x3   :  { %s547_s8 = smov 0   ;;  %s549_s9 = smov 0  }
   0x4   :  { %s551_s10 = smov 0   ;;  %s553_s11 = smov 0  }
   0x5 LB: > { %s342_s12 = sadd.s32 4294967295, %s527_s11   ;;  %s24_s13 = sadd.s32 1, %s523_s10  ;;  %s527_s11 = sphi %s553_s11, %s15_s11   ;;  %s523_s10 = sphi %s551_s10, %s679_s10   ;;  %s519_s9 = sphi %s549_s9, %s678_s9   ;;  %s515_s8 = sphi %s547_s8, %s677_s8   ;;  %s511_s7 = sphi %s545_s7, %s676_s7   ;;  %s507_s6 = sphi %s543_s6, %s675_s6  }
   0x6   : > { %p25_p0 = scmp.ge.s32.totalorder %s24_s13, 2  ;;  %s36_s14 = sadd.s32 1, %s515_s8 }
   0x7   : > { %p43_p1 = scmp.ne.s32.totalorder %s515_s8, %s511_s7  ;;  %p44_p2 = scmp.eq.s32.totalorder %s527_s11, 0 }
   0x8   : > { %s681_s13 = smov (%p25_p0, %s24_s13), 0  ;;  %p49_p4 = scmp.ne.s32.totalorder %s511_s7, %s507_s6 }
   0x9   : > { %p579_p3 = por %p44_p2, %p43_p1  ;;  %s31_s16 = ssub.s32 %s523_s10, %s681_s13 }
   0xa   : > { %p50_p5 = scmp.eq.s32.totalorder %s342_s12, 0  ;;  %p34_p6 = scmp.eq.s32.totalorder %s31_s16, 0 }
   0xb   : > { %p367_p8 = scmp.lt.s32.totalorder %s527_s11, 2  ;;  %s99_s19 = sand.u32 1, %s515_s8  }
   0xc   : > { %p588_p7 = por %p50_p5, %p49_p4  ;;  %s356_s20 = sshll.u32 %s523_s10, 8 }
   0xd   : > { %s594_s18 = scalar_select %p34_p6, %s515_s8, %s36_s14  }
   0xe   : > { %s345_s21 = sshll.u32 %s99_s19, 4  ;;  %s111_s24 = scalar_lea.hbm %s667_s0, %s356_s20 }
   0xf   : > { %s103_s25 = scalar_lea.vmem [#allocation3], %s345_s21  ;;  %p603_p9 = pnand %p367_p8, %p579_p3 }
  0x10   : > { %s113_s26 = sshll.u32 %s103_s25, 4  ;;  %p348_p10 = scmp.ge.s32.totalorder %s527_s11, 1  ;;  %s114_s26 = int_to_ptr.vmem [resolvable:$true] %s113_s26 }
  0x11   : > { %p118_p11 = scmp.lt.s32.totalorder %s527_s11, 3  ;;  %s100_s28 = scalar_lea.sflag [#allocation4], %s99_s19 }
  0x12   : > { %p423_p12 = pneg %p603_p9  ;;  %s434_s29 = scalar_lea.vmem %s114_s26, 256 }
  0x13   : > { %p435_p13 = scmp.ne.s32.totalorder %s114_s26, %s434_s29  ;;  %s529_s30 = smov [#allocation3]  }
  0x14   : > { %s439_s2 = sshll.u32 %s529_s30, 4  ;;  %s440_s2 = int_to_ptr.vmem [resolvable:$false] %s439_s2 }
  0x15   : > { %p437_p0 = pnand %p435_p13, %p423_p12  ;;  %s441_s3 = scalar_lea.vmem %s440_s2, 512 }
  0x16   : > { %p442_p2 = scmp.lt.s32.totalorder %s114_s26, %s440_s2  ;;  %p443_p3 = scmp.lt.s32.totalorder %s441_s3, %s434_s29 }
  0x17   : > { %p438_p1 = pneg %p437_p0 }
  0x18   : > { %p444_p4 = por %p443_p3, %p442_p2 }
  0x1a   : > { %p445_p5 = pnand %p444_p4, %p438_p1 }
  0x1c   : > { %448 = shalt.err (!%p445_p5)
}
  0x1d   : > { %366 = dma.hbm_to_vmem [thread:$0]  (!%p603_p9), %s111_s24, 256, %s114_s26, %s100_s28  }
  0x1e   : > { %p119_p6 = pnand %p348_p10, %p118_p11 }
  0x1f   : > { %s124_s4 = sand.u32 (!%p119_p6), 1, %s511_s7  }
  0x20   : > { %122 = sbr.rel (%p119_p6) target bundleno = 89 (0x59), region = 24  ;;  %s349_s5 = sshll.u32 (!%p119_p6), %s124_s4, 4 }
  0x21   : > { %s125_s6 = scalar_lea.sflag (!%p119_p6), [#allocation4], %s124_s4  ;;  %s128_s14 = scalar_lea.vmem (!%p119_p6), [#allocation3], %s349_s5 }
  0x25   : > { %498 = dma.done.wait (%p588_p7), %s125_s6, 256  }
  0x26   : > { %500 = vsyncadd (%p588_p7), %s125_s6, 4294967040  ;;  %p350_p8 = scmp.ne.s32.totalorder %s519_s9, 0 }
  0x28   : > { %146 = sbr.rel (%p350_p8) target bundleno = 49 (0x31), region = 32 }
  0x2d   : > { %v147_v0 = vlaneseq  ;;  %v530_v1 = vmov 0.0  }
  0x2f   : > { %vm149_vm0 = vcmp.lt.s32.totalorder %v147_v0, 256 }
  0x30   : > { %151 = vst.msk [vmem:[#allocation6] sm:$0x3] %vm149_vm0, %v530_v1  ;;  %152 = vst.msk [vmem:[#allocation2] sm:$0x3] %vm149_vm0, %v530_v1 }
  0x31 PF: > { %s351_s15 = sshll.u32 %s519_s9, 3  ;;  %v163_v2 = vlaneseq  ;;  %v169_v3 = vld [vmem:[%s128_s14] sm:$0xff]  ;;  %v170_v4 = vld [vmem:[%s128_s14 + $0x8] sm:$0xff]  ;;  %v531_v7 = vmov 1966171168   ;;  %s532_s9 = smov [#allocation6]  }
  0x32   : > { %v189_v5 = vstv %s351_s15  ;;  %v214_v8 = vunpack.c.l.s4 %v531_v7  ;;  %v172_v10 = vrot.slane %v169_v3, 7  ;;  %v173_v11 = vrot.slane %v170_v4, 7  ;;  %s278_s16 = sshll.u32 %s532_s9, 4  ;;  %p632_p7 = scmp.eq.s32.totalorder %s342_s12, 1  ;;  %s279_s16 = int_to_ptr.vmem [resolvable:$true] %s278_s16 }
  0x33   : > { %v164_v6 = vshrl.u32 %v163_v2, 7  ;;  %v212_v16 = vcombine.high %v169_v3, %v170_v4  ;;  %vm624_vm5 = vcmp.lt.s32.totalorder %v163_v2, 256  ;;  %s449_s19 = scalar_lea.vmem %s279_s16, 32  ;;  %p456_p12 = scmp.lt.s32.totalorder %s279_s16, %s279_s16 }
  0x34   : > { %v215_v15 = vunpack.c.0.s8 %v214_v8  ;;  %p450_p9 = scmp.ne.s32.totalorder %s279_s16, %s449_s19  ;;  %p457_p13 = scmp.lt.s32.totalorder %s449_s19, %s449_s19 }
  0x35   : > { %v179_v12 = vsub.s32 0, %v164_v6  ;;  %v183_v13 = vsub.s32 1, %v164_v6  ;;  %v190_v14 = vadd.s32 %v189_v5, %v164_v6  ;;  %vm171_vm1 = vcmp.eq.s32.totalorder %v164_v6, 0 }
  0x36   : > { %v218_v19 = vsub.s32 %v215_v15, %v164_v6  ;;  %p451_p10 = pnand %p450_p9, %p632_p7  ;;  %p458_p0 = por %p457_p13, %p456_p12 }
  0x37   : > { %v165_v9 = vld [vmem:[#allocation2] sm:$0x3]  ;;  %vm191_vm2 = vcmp.ge.s32.totalorder %v190_v14, 1  ;;  %vm192_vm3 = vcmp.lt.s32.totalorder %v190_v14, 16  ;;  %v235_v47 = vld [vmem:[#allocation6] sm:$0x3] }
  0x38   : > { %v180_v17 = vrot.slane %v165_v9, %v179_v12  ;;  %v184_v18 = vrot.slane %v165_v9, %v183_v13  ;;  %vm193_vm4 = vmand %vm191_vm2, %vm192_vm3  ;;  %v219_v24 = vrot.slane %v212_v16, %v218_v19  ;;  %p452_p11 = pneg %p451_p10 }
  0x3a   : > { %v187_v20 = vsel %vm171_vm1, %v180_v17, %v172_v10  ;;  %v188_v21 = vsel %vm171_vm1, %v184_v18, %v173_v11  ;;  %v220_v27 = vcombine.high %v219_v24, %v219_v24  ;;  %p459_p1 = pnand %p458_p0, %p452_p11 }
  0x3b   : > { %v202_v22 = vsub.f32 %v169_v3, %v187_v20  ;;  %v203_v23 = vsub.f32 %v170_v4, %v188_v21 }
  0x3c   : > { %v227_v30 = vrot.slane %v220_v27, %v218_v19 }
  0x3d   : > { %v204_v25 = vsel %vm193_vm4, %v202_v22, 0.0  ;;  %v205_v26 = vsel %vm193_vm4, %v203_v23, 0.0 }
  0x3e   : > { %v206_v28 = vmul.f32 %v204_v25, %v204_v25  ;;  %v207_v29 = vmul.f32 %v205_v26, %v205_v26  ;;  %v228_v34 = vcombine.high %v227_v30, %v227_v30 }
  0x40   : > { %v236_v32 = vrot.slane %v206_v28, 4  ;;  %v242_v33 = vrot.slane %v207_v29, 4  ;;  %234 = vst.msk [vmem:[#allocation2] sm:$0x3] %vm624_vm5, %v228_v34 }
  0x42   : > { %v237_v35 = vadd.f32 %v236_v32, %v206_v28  ;;  %v243_v36 = vadd.f32 %v242_v33, %v207_v29 }
  0x44   : > { %v238_v37 = vrot.slane %v237_v35, 2  ;;  %v244_v38 = vrot.slane %v243_v36, 2 }
  0x46   : > { %v239_v39 = vadd.f32 %v238_v37, %v237_v35  ;;  %v245_v40 = vadd.f32 %v244_v38, %v243_v36 }
  0x48   : > { %v240_v41 = vrot.slane %v239_v39, 1  ;;  %v246_v42 = vrot.slane %v245_v40, 1 }
  0x4a   : > { %v241_v43 = vadd.f32 %v240_v41, %v239_v39  ;;  %v247_v44 = vadd.f32 %v246_v42, %v245_v40 }
  0x4c   : > { %v250_v45 = vcombine.low %v241_v43, %v247_v44 }
  0x4e   : > { %v257_v46 = vrot.slane %v250_v45, %v218_v19 }
  0x50   : > { %v264_v48 = vrot.slane %v257_v46, %v218_v19 }
  0x52   : > { %v266_v49 = vadd.f32 %v264_v48, %v235_v47 }
  0x54   : > { %267 = vst.msk [vmem:[#allocation6] sm:$0x3] %vm624_vm5, %v266_v49 }
  0x55   : > { %462 = shalt.err (!%p459_p1)
}
  0x56   : > { %360 = dma.vmem_to_hbm [thread:$0]  (%p632_p7), %s279_s16, 32, %s668_s1, [#allocation5]  }
  0x57   : > { %502 = dma.done.wait (%p632_p7), [#allocation5], 32  }
  0x58   : > { %504 = vsyncadd (%p632_p7), [#allocation5], 4294967264 }
  0x59 PF: > { %s15_s11 = sadd.s32 1, %s527_s11   ;;  %s675_s6 = smov %s511_s7 }
  0x5a   : > { %p12_p2 = scmp.ge.s32.totalorder %s15_s11, 4   ;;  %s676_s7 = smov %s515_s8 }
  0x5b   : > { %s677_s8 = smov %s594_s18  ;;  %s678_s9 = smov %s523_s10 }
  0x5c   : > { %s679_s10 = smov %s681_s13  ;;  %14 = sbr.rel (!%p12_p2) target bundleno = 5 (0x5), region = 67 }
  0x61   :  { %291 = vsyncpa [#allocation4], 1 }
  0x62   :  { %293 = vsyncpa [#allocation4 + $0x1], 1 }
  0x63   :  { %294 = vsyncpa [#allocation5], 1 }
  0x64   :  { %296 = vsyncpa [#allocation5 + $0x1], 1 }

</bundles_post_ra>
